<compile_context>
chip_gen: v6e
topology: v6e:2x2x1
jax: 0.10.0
libtpu: 0.0.40
codegen_flags: <defaults>
</compile_context>

<pallas_src>
import jax
import jax.numpy as jnp
from jax.experimental import pallas as pl
from jax.experimental.pallas import tpu as pltpu


def _round_up(x, m):
    return (x + m - 1) // m * m


def _mlp_kernel(xp_ref, xa_ref, w1p_ref, w1a_ref, b1_ref, w2_ref, b2_ref, o_ref):
    # In-kernel bf16 cast of the f32 activation tiles (hides under the DMA).
    xp = xp_ref[...].astype(w1p_ref.dtype)
    xa = xa_ref[...].astype(w1a_ref.dtype)
    # First linear as a split-K contraction (replaces the torch.cat):
    #   h = phi @ w1[:F] + act @ w1[F:] + b1
    h = jnp.dot(xp, w1p_ref[...], preferred_element_type=jnp.float32)
    h = h + jnp.dot(xa, w1a_ref[...], preferred_element_type=jnp.float32)
    # Bias + ReLU in f32.
    h = jnp.maximum(h + b1_ref[...], 0.0)
    # Second linear (bf16 operands -> MXU native rate, f32 accumulation) + bias.
    o = jnp.dot(h.astype(w2_ref.dtype), w2_ref[...],
                preferred_element_type=jnp.float32)
    o_ref[...] = (o + b2_ref[...]).astype(o_ref.dtype)


def ndigo_forward_pallas(phi1, action_seqs, w1, b1, w2, b2, *,
                         block_rows=1024, out_dtype=jnp.bfloat16):
    """phi1: (T, B, feature_size), action_seqs: (T, B, action_size*horizon).

    out_dtype defaults to bf16 (halves the dominant output HBM traffic); pass
    out_dtype=phi1.dtype if bit-width parity with the torch module is needed.
    """
    T, B, F = phi1.shape
    A = action_seqs.shape[2]
    d_in = F + A
    hidden = w1.shape[1]
    d_out = w2.shape[1]
    n_rows = T * B

    # Row tile: multiple of 8 (sublane), capped at block_rows. Cap it further
    # so the "parallel" grid has >= 2 steps whenever n_rows allows it (keeps
    # both v7x TensorCores busy and enables pipelining on all generations).
    tm = min(block_rows, _round_up(n_rows, 8))
    if n_rows > 8:
        tm = min(tm, _round_up(-(-n_rows // 2), 8))
    grid = (pl.cdiv(n_rows, tm),)  # ragged last block handled by Pallas masking

    # Row slabs stay f32 (reshape is metadata-only; cast happens in-kernel).
    xp = phi1.reshape(n_rows, F)
    xa = action_seqs.reshape(n_rows, A)

    # Split first-layer weight so no concatenated slab ever exists.
    # Weights/biases are tiny and VMEM-resident across the whole grid.
    cdt = jnp.bfloat16
    w1p = w1[:F].astype(cdt)
    w1a = w1[F:].astype(cdt)
    w2c = w2.astype(cdt)
    b1_2d = b1.reshape(1, hidden).astype(jnp.float32)
    b2_2d = b2.reshape(1, d_out).astype(jnp.float32)

    out_itemsize = jnp.dtype(out_dtype).itemsize
    cost = pl.CostEstimate(
        flops=2 * n_rows * (d_in * hidden + hidden * d_out),
        transcendentals=0,
        bytes_accessed=(
            xp.size * xp.dtype.itemsize
            + xa.size * xa.dtype.itemsize
            + (w1p.size + w1a.size + w2c.size) * 2
            + (b1_2d.size + b2_2d.size) * 4
            + n_rows * d_out * out_itemsize
        ),
    )

    out = pl.pallas_call(
        _mlp_kernel,
        out_shape=jax.ShapeDtypeStruct((n_rows, d_out), out_dtype),
        grid_spec=pltpu.PrefetchScalarGridSpec(
            num_scalar_prefetch=0,
            grid=grid,
            in_specs=[
                pl.BlockSpec((tm, F), lambda i: (i, 0)),          # phi rows (f32)
                pl.BlockSpec((tm, A), lambda i: (i, 0)),          # action rows (f32)
                pl.BlockSpec((F, hidden), lambda i: (0, 0)),      # w1[:F]  (resident)
                pl.BlockSpec((A, hidden), lambda i: (0, 0)),      # w1[F:]  (resident)
                pl.BlockSpec((1, hidden), lambda i: (0, 0)),      # b1      (resident)
                pl.BlockSpec((hidden, d_out), lambda i: (0, 0)),  # w2      (resident)
                pl.BlockSpec((1, d_out), lambda i: (0, 0)),       # b2      (resident)
            ],
            out_specs=pl.BlockSpec((tm, d_out), lambda i: (i, 0)),
        ),
        compiler_params=pltpu.CompilerParams(
            dimension_semantics=("parallel",),
        ),
        cost_estimate=cost,
    )(xp, xa, w1p, w1a, b1_2d, w2c, b2_2d)

    return out.reshape(T, B, d_out)


def init_params(key, feature_size, action_size, horizon):
    """Deterministic init mirroring nn.Linear defaults (U[-1/sqrt(fan_in), +])."""
    d_in = feature_size + action_size * horizon
    hidden, d_out = 64, 256
    k1, k2, k3, k4 = jax.random.split(key, 4)
    bound1 = 1.0 / jnp.sqrt(d_in)
    bound2 = 1.0 / jnp.sqrt(hidden)
    w1 = jax.random.uniform(k1, (d_in, hidden), jnp.float32, -bound1, bound1)
    b1 = jax.random.uniform(k2, (hidden,), jnp.float32, -bound1, bound1)
    w2 = jax.random.uniform(k3, (hidden, d_out), jnp.float32, -bound2, bound2)
    b2 = jax.random.uniform(k4, (d_out,), jnp.float32, -bound2, bound2)
    return w1, b1, w2, b2


if __name__ == "__main__":
    # module config (small, consistent with the forward)
    feature_size, action_size, horizon = 32, 4, 2
    T, B = 8, 2  # seq len, batch

    key = jax.random.PRNGKey(0)
    kp, kphi, kact = jax.random.split(key, 3)
    w1, b1, w2, b2 = init_params(kp, feature_size, action_size, horizon)

    phi1 = jax.random.normal(kphi, (T, B, feature_size), jnp.float32)
    action_seqs = jax.random.normal(kact, (T, B, action_size * horizon), jnp.float32)

    out = ndigo_forward_pallas(phi1, action_seqs, w1, b1, w2, b2)
    out = jax.block_until_ready(out)

    # reference check in plain JAX (f32); kernel uses bf16 operands with f32
    # accumulation and a bf16 output store, so tolerance is ~1e-2 relative.
    x = jnp.concatenate([phi1, action_seqs], axis=2)
    ref = jnp.maximum(x @ w1 + b1, 0.0) @ w2 + b2
    out_f32 = out.astype(jnp.float32)
    assert out.shape == (T, B, 256)
    assert jnp.allclose(out_f32, ref, atol=7e-2, rtol=5e-2), float(
        jnp.max(jnp.abs(out_f32 - ref)))

    print("KERNEL_OK")
</pallas_src>

<mosaic_0001>
module attributes {stable_mosaic.version = 11 : i64} {
  func.func @_mlp_kernel(%arg0: i32, %arg1: memref<8x32xf32, #tpu.memory_space<vmem>>, %arg2: memref<8x8xf32, #tpu.memory_space<vmem>>, %arg3: memref<32x64xbf16, #tpu.memory_space<vmem>>, %arg4: memref<8x64xbf16, #tpu.memory_space<vmem>>, %arg5: memref<1x64xf32, #tpu.memory_space<vmem>>, %arg6: memref<64x256xbf16, #tpu.memory_space<vmem>>, %arg7: memref<1x256xf32, #tpu.memory_space<vmem>>, %arg8: memref<8x256xbf16, #tpu.memory_space<vmem>>) attributes {dimension_semantics = [#tpu.dimension_semantics<parallel>], iteration_bounds = array<i64: 2>, scalar_prefetch = 0 : i64, scratch_operands = 0 : i64, tpu.core_type = #tpu.core_type<tc>, window_params = [{transform_indices = @transform_0, window_bounds = array<i64: 8, 32>}, {transform_indices = @transform_1, window_bounds = array<i64: 8, 8>}, {pipeline_mode = #tpu.pipeline_mode<synchronous>, transform_indices = @transform_2, window_bounds = array<i64: 32, 64>}, {pipeline_mode = #tpu.pipeline_mode<synchronous>, transform_indices = @transform_3, window_bounds = array<i64: 8, 64>}, {pipeline_mode = #tpu.pipeline_mode<synchronous>, transform_indices = @transform_4, window_bounds = array<i64: 1, 64>}, {pipeline_mode = #tpu.pipeline_mode<synchronous>, transform_indices = @transform_5, window_bounds = array<i64: 64, 256>}, {pipeline_mode = #tpu.pipeline_mode<synchronous>, transform_indices = @transform_6, window_bounds = array<i64: 1, 256>}, {transform_indices = @transform_7, window_bounds = array<i64: 8, 256>}]} {
    %c0 = arith.constant 0 : index
    %c0_0 = arith.constant 0 : index
    %0 = vector.load %arg1[%c0, %c0_0] : memref<8x32xf32, #tpu.memory_space<vmem>>, vector<8x32xf32>
    %1 = arith.truncf %0 : vector<8x32xf32> to vector<8x32xbf16>
    %c0_1 = arith.constant 0 : index
    %c0_2 = arith.constant 0 : index
    %2 = vector.load %arg2[%c0_1, %c0_2] : memref<8x8xf32, #tpu.memory_space<vmem>>, vector<8x8xf32>
    %3 = arith.truncf %2 : vector<8x8xf32> to vector<8x8xbf16>
    %c0_3 = arith.constant 0 : index
    %c0_4 = arith.constant 0 : index
    %4 = vector.load %arg3[%c0_3, %c0_4] : memref<32x64xbf16, #tpu.memory_space<vmem>>, vector<32x64xbf16>
    %cst = arith.constant dense<0.000000e+00> : vector<8x64xf32>
    %5 = tpu.matmul %1, %4, %cst {dimension_numbers = #tpu.dot_dimension_numbers<[1], [0], [0], [1], [0, 0, 1, 1], [], []>} : vector<8x32xbf16>, vector<32x64xbf16>, vector<8x64xf32> -> vector<8x64xf32>
    %c0_5 = arith.constant 0 : index
    %c0_6 = arith.constant 0 : index
    %6 = vector.load %arg4[%c0_5, %c0_6] : memref<8x64xbf16, #tpu.memory_space<vmem>>, vector<8x64xbf16>
    %cst_7 = arith.constant dense<0.000000e+00> : vector<8x64xf32>
    %7 = tpu.matmul %3, %6, %cst_7 {dimension_numbers = #tpu.dot_dimension_numbers<[1], [0], [0], [1], [0, 0, 1, 1], [], []>} : vector<8x8xbf16>, vector<8x64xbf16>, vector<8x64xf32> -> vector<8x64xf32>
    %8 = arith.addf %5, %7 : vector<8x64xf32>
    %c0_8 = arith.constant 0 : index
    %c0_9 = arith.constant 0 : index
    %9 = vector.load %arg5[%c0_8, %c0_9] : memref<1x64xf32, #tpu.memory_space<vmem>>, vector<1x64xf32>
    %10 = vector.broadcast %9 : vector<1x64xf32> to vector<8x64xf32>
    %11 = arith.addf %8, %10 : vector<8x64xf32>
    %cst_10 = arith.constant 0.000000e+00 : f32
    %12 = vector.broadcast %cst_10 : f32 to vector<8x64xf32>
    %13 = arith.maximumf %11, %12 : vector<8x64xf32>
    %14 = arith.truncf %13 : vector<8x64xf32> to vector<8x64xbf16>
    %c0_11 = arith.constant 0 : index
    %c0_12 = arith.constant 0 : index
    %15 = vector.load %arg6[%c0_11, %c0_12] : memref<64x256xbf16, #tpu.memory_space<vmem>>, vector<64x256xbf16>
    %cst_13 = arith.constant dense<0.000000e+00> : vector<8x256xf32>
    %16 = tpu.matmul %14, %15, %cst_13 {dimension_numbers = #tpu.dot_dimension_numbers<[1], [0], [0], [1], [0, 0, 1, 1], [], []>} : vector<8x64xbf16>, vector<64x256xbf16>, vector<8x256xf32> -> vector<8x256xf32>
    %c0_14 = arith.constant 0 : index
    %c0_15 = arith.constant 0 : index
    %17 = vector.load %arg7[%c0_14, %c0_15] : memref<1x256xf32, #tpu.memory_space<vmem>>, vector<1x256xf32>
    %18 = vector.broadcast %17 : vector<1x256xf32> to vector<8x256xf32>
    %19 = arith.addf %16, %18 : vector<8x256xf32>
    %20 = arith.truncf %19 : vector<8x256xf32> to vector<8x256xbf16>
    %c0_16 = arith.constant 0 : index
    %c0_17 = arith.constant 0 : index
    %21 = vector.load %arg8[%c0_16, %c0_17] : memref<8x256xbf16, #tpu.memory_space<vmem>>, vector<8x256xbf16>
    tpu.vector_store %arg8[%c0_16, %c0_17], %20 {strides = array<i32>} : memref<8x256xbf16, #tpu.memory_space<vmem>>, vector<8x256xbf16>,
    return
  }
  func.func @transform_0(%arg0: i32) -> (i32, i32) {
    %c0_i32 = arith.constant 0 : i32
    %c0_i32_0 = arith.constant 0 : i32
    return %arg0, %c0_i32 : i32, i32
  }
  func.func @transform_1(%arg0: i32) -> (i32, i32) {
    %c0_i32 = arith.constant 0 : i32
    %c0_i32_0 = arith.constant 0 : i32
    return %arg0, %c0_i32 : i32, i32
  }
  func.func @transform_2(%arg0: i32) -> (i32, i32) {
    %c0_i32 = arith.constant 0 : i32
    %c0_i32_0 = arith.constant 0 : i32
    %c0_i32_1 = arith.constant 0 : i32
    return %c0_i32, %c0_i32_0 : i32, i32
  }
  func.func @transform_3(%arg0: i32) -> (i32, i32) {
    %c0_i32 = arith.constant 0 : i32
    %c0_i32_0 = arith.constant 0 : i32
    %c0_i32_1 = arith.constant 0 : i32
    return %c0_i32, %c0_i32_0 : i32, i32
  }
  func.func @transform_4(%arg0: i32) -> (i32, i32) {
    %c0_i32 = arith.constant 0 : i32
    %c0_i32_0 = arith.constant 0 : i32
    %c0_i32_1 = arith.constant 0 : i32
    return %c0_i32, %c0_i32_0 : i32, i32
  }
  func.func @transform_5(%arg0: i32) -> (i32, i32) {
    %c0_i32 = arith.constant 0 : i32
    %c0_i32_0 = arith.constant 0 : i32
    %c0_i32_1 = arith.constant 0 : i32
    return %c0_i32, %c0_i32_0 : i32, i32
  }
  func.func @transform_6(%arg0: i32) -> (i32, i32) {
    %c0_i32 = arith.constant 0 : i32
    %c0_i32_0 = arith.constant 0 : i32
    %c0_i32_1 = arith.constant 0 : i32
    return %c0_i32, %c0_i32_0 : i32, i32
  }
  func.func @transform_7(%arg0: i32) -> (i32, i32) {
    %c0_i32 = arith.constant 0 : i32
    %c0_i32_0 = arith.constant 0 : i32
    return %arg0, %c0_i32 : i32, i32
  }
}

</mosaic_0001>

<bundles_post_ra>
// kernel: tpu_custom_call.1
= control target key start
LH: loop header
LB: loop body
LE: loop exit
PB: predicated region body
PF: predicated region fallthrough
CT: control target
= control target key end

     0   :  { %12 = vsyncpa [#allocation3], 0  ;;  %s1120_s0 = inlined_call_operand.vmem [shape: f32[16,32], index: 0, kind: input, shape index: {}]   ;;  %s1121_s1 = inlined_call_operand.vmem [shape: f32[16,8], index: 1, kind: input, shape index: {}]   ;;  %s1122_s2 = inlined_call_operand.hbm [shape: bf16[32,64], index: 2, kind: input, shape index: {}]   ;;  %s1123_s3 = inlined_call_operand.vmem [shape: bf16[8,64], index: 3, kind: input, shape index: {}]   ;;  %s1124_s4 = inlined_call_operand.vmem [shape: f32[1,64], index: 4, kind: input, shape index: {}]   ;;  %s1125_s5 = inlined_call_operand.hbm [shape: bf16[64,256], index: 5, kind: input, shape index: {}]   ;;  %s1126_s6 = inlined_call_operand.vmem [shape: f32[1,256], index: 6, kind: input, shape index: {}]   ;;  %s1127_s7 = inlined_call_operand.hbm [shape: bf16[16,256], index: 7, kind: output, shape index: {}]  }
   0x1   :  { %13 = vsyncpa [#allocation6], 0 }
   0x2   :  { %14 = vsyncpa [#allocation4], 0 }
   0x3   :  { %16 = vsyncpa [#allocation4 + $0x1], 0  ;;  %s972_s24 = smov 0   ;;  %s974_s25 = smov 0  }
   0x4   :  { %s976_s26 = smov 0   ;;  %s978_s27 = smov 0  }
   0x5 LB: > { %s993_s28 = sadd.s32 4294967295, %s920_s27   ;;  %s667_s29 = sadd.s32 4294967294, %s920_s27   ;;  %s920_s27 = sphi %s978_s27, %s1141_s27   ;;  %s916_s26 = sphi %s976_s26, %s1140_s26   ;;  %s912_s25 = sphi %s974_s25, %s1139_s25   ;;  %s908_s24 = sphi %s972_s24, %s1138_s24  }
   0x6   : > { %s997_s30 = sadd.s32 1, %s920_s27   ;;  %s186_s8 = sadd.s32 1, %s916_s26 }
   0x7   : > { %s183_s9 = ssub.s32 %s920_s27, %s997_s30  ;;  %p196_p0 = scmp.ne.s32.totalorder %s916_s26, %s912_s25 }
   0x8   : > { %p184_p1 = scmp.eq.s32.totalorder %s183_s9, 0  ;;  %p197_p2 = scmp.eq.s32.totalorder %s993_s28, 1 }
   0x9   : > { %p202_p3 = scmp.ne.s32.totalorder %s912_s25, %s908_s24  ;;  %p203_p4 = scmp.eq.s32.totalorder %s667_s29, 1 }
   0xa   : > { %s1008_s10 = scalar_select %p184_p1, %s916_s26, %s186_s8  }
   0xb   : > { %p1010_p5 = por %p197_p2, %p196_p0  ;;  %p1014_p6 = por %p203_p4, %p202_p3 }
   0xc   : > { %p668_p7 = scmp.ge.s32.totalorder %s920_s27, 1  ;;  %p210_p8 = scmp.lt.s32.totalorder %s920_s27, 3 }
   0xd   : > { %s1130_s12 = scalar_select %p1014_p6, 1, 0 }
   0xe   : > { %p1128_p9 = scmp.eq.s32.totalorder %s993_s28, 0  ;;  %p1021_p10 = pnand %p668_p7, %p210_p8 }
   0xf   : > { %s922_s14 = smov [#allocation2]   ;;  %s923_s17 = smov [#allocation5]  }
  0x10   : > { %s222_s15 = sshll.u32 %s922_s14, 4  ;;  %p729_p11 = pneg %p1021_p10  ;;  %s223_s15 = int_to_ptr.vmem [resolvable:$true] %s222_s15 }
  0x11   : > { %s241_s18 = sshll.u32 %s923_s17, 4  ;;  %s811_s19 = scalar_lea.vmem %s223_s15, 256  ;;  %s242_s18 = int_to_ptr.vmem [resolvable:$true] %s241_s18 }
  0x12   : > { %p1029_p12 = pnand %p1128_p9, %p729_p11  ;;  %p812_p0 = scmp.ne.s32.totalorder %s223_s15, %s811_s19 }
  0x13   : > { %p819_p3 = scmp.lt.s32.totalorder %s223_s15, %s223_s15  ;;  %p820_p4 = scmp.lt.s32.totalorder %s811_s19, %s811_s19 }
  0x14   : > { %p802_p13 = pneg %p1029_p12 }
  0x15   : > { %p821_p7 = por %p820_p4, %p819_p3 }
  0x16   : > { %p814_p1 = pnand %p812_p0, %p802_p13 }
  0x18   : > { %p815_p2 = pneg %p814_p1 }
  0x1a   : > { %p822_p8 = pnand %p821_p7, %p815_p2 }
  0x1c   : > { %825 = shalt.err (!%p822_p8)
}
  0x1d   : > { %s924_s20 = smov 64   ;;  %s925_s21 = smov 4  }
  0x1e   : > { %732 = dma.hbm_to_vmem [thread:$0]  (!%p1029_p12), %s1122_s2, 256, %s223_s15, [#allocation3], %s924_s20, %s924_s20, %s925_s21  }
  0x1f   : > { %s837_s29 = scalar_lea.vmem %s242_s18, 1024  ;;  %p845_p9 = scmp.lt.s32.totalorder %s242_s18, %s242_s18 }
  0x20   : > { %p838_p11 = scmp.ne.s32.totalorder %s242_s18, %s837_s29  ;;  %p846_p6 = scmp.lt.s32.totalorder %s837_s29, %s837_s29 }
  0x22   : > { %p840_p0 = pnand %p838_p11, %p802_p13  ;;  %p847_p3 = por %p846_p6, %p845_p9 }
  0x24   : > { %p841_p1 = pneg %p840_p0 }
  0x26   : > { %p848_p2 = pnand %p847_p3, %p841_p1 }
  0x28   : > { %851 = shalt.err (!%p848_p2)
}
  0x29   : > { %s926_s8 = smov 128   ;;  %s927_s9 = smov 8  }
  0x2a   : > { %735 = dma.hbm_to_vmem [thread:$0]  (!%p1029_p12), %s1125_s5, 1024, %s242_s18, [#allocation6], %s926_s8, %s926_s8, %s927_s9  }
  0x2b   : > { %274 = sbr.rel (%p1021_p10) target bundleno = 482 (0x1e2), region = 48  ;;  %p1133_p4 = scmp.eq.s32.totalorder (!%p1021_p10), %s993_s28, 0 }
  0x30   : > { %895 = dma.done.wait (%p1133_p4), [#allocation3], 256   ;;  %p1134_p13 = pmov %p1133_p4 }
  0x31   : > { %p1135_p6 = pmov %p1133_p4 }
  0x32   : > { %897 = vsyncadd (%p1134_p13), [#allocation3], 4294967040 }
  0x33   : > { %899 = dma.done.wait (%p1135_p6), [#allocation6], 1024   ;;  %p1136_p9 = pmov %p1133_p4 }
  0x34   : > { %p313_p7 = scmp.lt.s32.totalorder %s993_s28, 1  ;;  %v928_v0 = vmov 0.0   ;;  %vm929_vm0 = vmmov 0   ;;  %vm335_vm1 = vcmask 1043456   ;;  %v330_v1 = vld [vmem:[%s1123_s3] sm:$0xf]  ;;  %v455_v31 = vlaneseq }
  0x35   : > { %901 = vsyncadd (%p1136_p9), [#allocation6], 4294966272  ;;  %705 = vmatprep.subr.bf16.mxu1 %v928_v0  ;;  %707 = vmatprep.mubr.msk.bf16.mxu1 %vm929_vm0, %v928_v0  ;;  %v337_v3 = vsel %vm335_vm1, %v330_v1, 0  ;;  %vm331_vm2 = vcmask 64512   ;;  %v786_v5 = vld [vmem:[#allocation2 + $0x8] sm:$0xff]   ;;  %v787_v7 = vld [vmem:[#allocation2] sm:$0xff]  }
  0x36   : > { %s314_s13 = scalar_select %p313_p7, %s993_s28, 1  ;;  %706 = vmatpush3.bf16.msra.mxu1 %v337_v3  ;;  %vm391_vm3 = vcmask 261120   ;;  %v788_v9 = vld [vmem:[#allocation5 + $0x34] ss:$8 sps:$4 sm:$0xff]   ;;  %v790_v10 = vld [vmem:[#allocation5 + $0x30] ss:$8 sps:$4 sm:$0xff]  }
  0x37   : > { %711 = vmatprep.subr.bf16.mxu1 %v928_v0  ;;  %517 = vmatprep.subr.bf16.mxu0 %v788_v9  ;;  %v791_v11 = vld [vmem:[#allocation5 + $0x24] ss:$8 sps:$4 sm:$0xff]   ;;  %v793_v12 = vld [vmem:[#allocation5 + $0x20] ss:$8 sps:$4 sm:$0xff]   ;;  %v794_v13 = vld [vmem:[#allocation5 + $0x14] ss:$8 sps:$4 sm:$0xff]  }
  0x38   : > { %s676_s15 = sshll.u32 %s314_s13, 3  ;;  %518 = vmatpush1.bf16.msra.mxu0 %v790_v10  ;;  %v796_v14 = vld [vmem:[#allocation5 + $0x10] ss:$8 sps:$4 sm:$0xff]   ;;  %v797_v15 = vld [vmem:[#allocation5 + $0x4] ss:$8 sps:$4 sm:$0xff]   ;;  %v930_v17 = vmov 0  }
  0x39   : > { %s320_s19 = scalar_lea.vmem %s1121_s1, %s676_s15  ;;  %s316_s29 = scalar_lea.vmem %s1120_s0, %s676_s15  ;;  %519 = vmatprep.subr.bf16.mxu0 %v791_v11  ;;  %v799_v16 = vld [vmem:[#allocation5] ss:$8 sps:$4 sm:$0xff]   ;;  %541 = vmatprep.mubr.bf16.mxu0 %v930_v17  ;;  %v682_v23 = vld [vmem:[%s1124_s4] ss:$0 sm:$0xff]  ;;  %vm505_vm4 = vcmask 523264   ;;  %v456_v32 = vshrl.u32 %v455_v31, 7 }
  0x3a   : > { %v324_v2 = vld [vmem:[%s320_s19] sm:$0xff]  ;;  %s310_s14 = sand.u32 1, %s912_s25   ;;  %s699_s16 = sshll.u32 %s993_s28, 7 }
  0x3b   : > { %v325_v4 = vpack.c.bf16 %v324_v2, %v324_v2  ;;  %v322_v6 = vld [vmem:[%s316_s29] sm:$0xff]  ;;  %v457_v33 = vsub.s32 0, %v456_v32  ;;  %v461_v34 = vsub.s32 1, %v456_v32  ;;  %s675_s15 = sshll.u32 %s310_s14, 3  ;;  %s1085_s22 = scalar_lea.hbm %s1127_s7, %s699_s16 }
  0x3c   : > { %v323_v8 = vpack.c.bf16 %v322_v6, %v322_v6  ;;  %520 = vmatpush1.bf16.msra.mxu0 %v793_v12  ;;  %v453_v35 = vld [vmem:[%s1126_s6] sm:$0x3]  ;;  %s312_s18 = scalar_lea.vmem [#allocation7], %s675_s15  ;;  %s560_s23 = scalar_lea.sflag [#allocation4], %s310_s14 }
  0x3d   : > { %708 = vmatmul.mubr.msk.bf16.vlgmr.msra.gmra.mxu1 %vm331_vm2, %v325_v4  ;;  %521 = vmatprep.subr.bf16.mxu0 %v794_v13  ;;  %v458_v36 = vrot.slane %v453_v35, %v457_v33  ;;  %v462_v37 = vrot.slane %v453_v35, %v461_v34  ;;  %s574_s19 = sshll.u32 %s312_s18, 4  ;;  %s931_s28 = smov [#allocation7]   ;;  %s575_s19 = int_to_ptr.vmem [resolvable:$true] %s574_s19 }
  0x3e   : > { %712 = vmatpush3.bf16.msra.mxu1 %v786_v5  ;;  %715 = vmatprep.mubr.msk.bf16.mxu1 %vm929_vm0, %v928_v0  ;;  %s852_s29 = scalar_lea.vmem %s575_s19, 128  ;;  %s856_s8 = sshll.u32 %s931_s28, 4  ;;  %s857_s8 = int_to_ptr.vmem [resolvable:$false] %s856_s8 }
  0x3f   : > { %713 = vmatprep.subr.bf16.mxu1 %v928_v0  ;;  %p853_p10 = scmp.ne.s32.totalorder %s575_s19, %s852_s29  ;;  %s858_s9 = scalar_lea.vmem %s857_s8, 256 }
  0x40   : > { %522 = vmatpush1.bf16.msra.mxu0 %v796_v14  ;;  %p859_p11 = scmp.lt.s32.totalorder %s575_s19, %s857_s8  ;;  %p860_p0 = scmp.lt.s32.totalorder %s858_s9, %s852_s29 }
  0x41   : > { %523 = vmatprep.subr.bf16.mxu0 %v797_v15  ;;  %p854_p12 = pnand %p853_p10, %p1010_p5 }
  0x42   : > { %714 = vmatpush3.bf16.msra.mxu1 %v787_v7  ;;  %p861_p1 = por %p860_p0, %p859_p11 }
  0x43   : > { %p855_p8 = pneg %p854_p12 }
  0x44   : > { %524 = vmatpush1.bf16.msra.mxu0 %v799_v16 }
  0x45   : > { %716 = vmatmul.mubr.msk.bf16.vlgmr.msra.gmra.mxu1 %vm391_vm3, %v323_v8  ;;  %p862_p3 = pnand %p861_p1, %p855_p8 }
  0xfd   : > { %v373_v18 = vpop.f32.mrf.mxu1 }
  0xff   : > { %v709_v19 = vpop.f32.mrf.mxu1 }
 0x101   : > { %v376_v20 = vpop.f32.mrf.mxu1 }
 0x103   : > { %v710_v21 = vpop.f32.mrf.mxu1 }
 0x105   : > { %v429_v22 = vpop.f32.mrf.mxu1 }
 0x106   : > { %v430_v24 = vadd.f32 %v429_v22, %v373_v18 }
 0x107   : > { %v717_v25 = vpop.f32.mrf.mxu1 }
 0x108   : > { %v442_v26 = vadd.f32 %v682_v23, %v430_v24 }
 0x109   : > { %v432_v27 = vpop.f32.mrf.mxu1 }
 0x10a   : > { %v443_v28 = vmax.f32 %v442_v26, 0.0 }
 0x10b   : > { %v718_v29 = vpop.f32.mrf.mxu1 }
 0x10c   : > { %v444_v30 = vpack.c.bf16 %v443_v28, %v443_v28 }
 0x10e   : > { %691 = vmatmul.mubr.msk.bf16.vlgmr.msra.gmra.mxu0 %vm505_vm4, %v444_v30 }
 0x1ce   : > { %v543_v38 = vpop.f32.mrf.mxu0 }
 0x1cf   : > { %v544_v40 = vadd.f32 %v543_v38, %v458_v36 }
 0x1d0   : > { %v545_v39 = vpop.f32.mrf.mxu0 }
 0x1d1   : > { %v546_v41 = vadd.f32 %v545_v39, %v462_v37 }
 0x1d2   : > { %v547_v42 = vpop.f32.mrf.mxu0 }
 0x1d3   : > { %v698_v43 = vpack.c.bf16 %v546_v41, %v544_v40 }
 0x1d4   : > { %v548_v44 = vpop.f32.mrf.mxu0 }
 0x1d5   : > { %558 = vst [vmem:[%s312_s18] sm:$0xff] %v698_v43 }
 0x1d6   : > { %865 = shalt.err (!%p862_p3)
}
 0x1d7   : > { %s866_s17 = scalar_lea.hbm %s1085_s22, 128  ;;  %s870_s15 = scalar_lea.hbm %s1127_s7, 256 }
 0x1d8   : > { %p867_p2 = scmp.ne.s32.totalorder %s1085_s22, %s866_s17  ;;  %p871_p6 = scmp.lt.s32.totalorder %s1085_s22, %s1127_s7 }
 0x1d9   : > { %p872_p9 = scmp.lt.s32.totalorder %s870_s15, %s866_s17 }
 0x1da   : > { %p868_p4 = pnand %p867_p2, %p1010_p5 }
 0x1db   : > { %p873_p7 = por %p872_p9, %p871_p6 }
 0x1dc   : > { %p869_p13 = pneg %p868_p4 }
 0x1de   : > { %p874_p10 = pnand %p873_p7, %p869_p13 }
 0x1e0   : > { %877 = shalt.err (!%p874_p10)
}
 0x1e1   : > { %727 = dma.vmem_to_hbm [thread:$0]  (%p1010_p5), %s575_s19, 128, %s1085_s22, %s560_s23  }
 0x1e2 PF: > { %p744_p12 = scmp.ge.s32.totalorder %s920_s27, 2  ;;  %s586_s20 = sand.u32 1, %s908_s24  }
 0x1e3   : > { %p1137_p8 = scmp.ne.s32.totalorder %s1130_s12, 0  ;;  %s587_s21 = scalar_lea.sflag [#allocation4], %s586_s20 }
 0x1e5   : > { %p737_p11 = pnand %p744_p12, %p1137_p8 }
 0x1e7   : > { %p738_p0 = pneg %p737_p11 }
 0x1e9   : > { %903 = dma.done.wait (%p738_p0), %s587_s21, 128  }
 0x1ea   : > { %905 = vsyncadd (%p738_p0), %s587_s21, 4294967168  ;;  %p19_p1 = scmp.ge.s32.totalorder %s997_s30, 4   ;;  %s1138_s24 = smov %s912_s25 }
 0x1eb   : > { %s1139_s25 = smov %s916_s26  ;;  %s1140_s26 = smov %s1008_s10 }
 0x1ec   : > { %s1141_s27 = smov %s997_s30  ;;  %21 = sbr.rel (!%p19_p1) target bundleno = 5 (0x5), region = 95 }
 0x1f1   :  { %592 = vsyncpa [#allocation3], 1 }
 0x1f2   :  { %594 = vsyncpa [#allocation3 + $0x1], 1 }
 0x1f3   :  { %595 = vsyncpa [#allocation6], 1 }
 0x1f4   :  { %596 = vsyncpa [#allocation4], 1 }
 0x1f5   :  { %598 = vsyncpa [#allocation4 + $0x1], 1 }

</bundles_post_ra>
